<compile_context>
chip_gen: v7x
topology: tpu7x:2x2x1
jax: 0.10.0
libtpu: 0.0.40
codegen_flags: <defaults>
</compile_context>

<pallas_src>
import functools

import jax
import jax.numpy as jnp
from jax.experimental import pallas as pl
from jax.experimental.pallas import tpu as pltpu

H_BERT = 768   # BERT hidden size (fixed by nn.Linear(768, 256))
H_MLP = 256    # regressor hidden size
H_OUT = 1      # scalar score


def essay_scorer_kernel(h_ref, w1_ref, b1_ref, w2_ref, b2_ref, o_ref, acc_ref,
                        *, seq_len):
    """Grid = (batch_tiles, seq_tiles); seq is the (last) reduction axis.

    h_ref : [B_t, S_t, 768] bf16/f32  hidden-state tile (streamed, native dtype)
    w1_ref: [768, 256]      bf16      first linear weight (pinned)
    b1_ref: [1, 256]        f32       first linear bias   (pinned)
    w2_ref: [1, 256]        f32       second linear weight as a row (pinned)
    b2_ref: [1, 1]          f32       second linear bias  (pinned)
    o_ref : [B_t, 1]        f32       output scores
    acc_ref:[B_t, 768]      f32       running seq-sum accumulator (VMEM scratch)
    """
    s = pl.program_id(1)

    @pl.when(s == 0)
    def _init():
        acc_ref[...] = jnp.zeros_like(acc_ref)

    # Running seq-sum: widen to f32 in-register (VPU); the streamed tile stays
    # in its producer dtype in HBM/VMEM.
    acc_ref[...] += jnp.sum(h_ref[...].astype(jnp.float32), axis=1)

    @pl.when(s == pl.num_programs(1) - 1)
    def _finalize():
        # pooled_output = last_hidden_state.mean(dim=1)   (divides by full S,
        # ignoring attention_mask — matches PyTorch .mean(dim=1) exactly).
        pooled = acc_ref[...] * (1.0 / seq_len)                         # [B_t, 768] f32

        # Linear(768, 256) + ReLU on the MXU: bf16 operands, f32 accumulate.
        z1 = jnp.dot(pooled.astype(jnp.bfloat16), w1_ref[...],
                     preferred_element_type=jnp.float32) + b1_ref[...]  # [B_t, 256]
        a1 = jnp.maximum(z1, 0.0)

        # Dropout(0.1): identity at inference time.

        # Linear(256, 1): N=1 MXU matmul wastes output lanes -> VPU
        # broadcast-multiply + lane reduction instead.
        out = jnp.sum(a1 * w2_ref[...], axis=-1, keepdims=True) + b2_ref[...]  # [B_t, 1]
        o_ref[...] = out.astype(o_ref.dtype)


def essay_scorer_forward(hidden_states, w1, b1, w2, b2,
                         *, batch_tile=None, seq_tile=None):
    """hidden_states: [B, S, 768] (bf16 or f32, streamed as-is) -> scores [B, 1] f32."""
    B, S, H = hidden_states.shape
    assert H == H_BERT
    itemsize = jnp.dtype(hidden_states.dtype).itemsize
    # bf16 packs 16 sublanes per vreg; f32 packs 8.
    sublane_mult = 16 if itemsize == 2 else 8

    # --- tile selection -----------------------------------------------------
    if batch_tile is None:
        # Keep >=2 batch tiles when B permits (v7x dual-TC), while honoring the
        # (8,128) rule on the (batch_tile, 1) output block.
        if B >= 32 and B % 16 == 0:
            batch_tile = 16
        elif B >= 16 and B % 8 == 0:
            batch_tile = 8
        else:
            batch_tile = B
    if seq_tile is None:
        seq_tile = S
        for cand in (1024, 512, 256, 128, 64, 32, 16):
            if S % cand == 0:
                seq_tile = cand
                break
        # Keep the double-buffered stream inside a ~40 MiB VMEM budget
        # (safe on v7x's 64 MiB physical VMEM; plenty of headroom on v5e/v6e).
        budget = 40 * 1024 * 1024
        while (seq_tile > sublane_mult
               and 2 * batch_tile * seq_tile * H_BERT * itemsize > budget
               and S % (seq_tile // 2) == 0
               and (seq_tile // 2) % sublane_mult == 0):
            seq_tile //= 2

    assert B % batch_tile == 0 and S % seq_tile == 0
    assert batch_tile == B or batch_tile % 8 == 0
    assert seq_tile == S or seq_tile % sublane_mult == 0, (
        f"seq_tile={seq_tile} must be a multiple of {sublane_mult} for "
        f"{hidden_states.dtype} streams (or equal to S)")

    # Tiny one-off casts (weights, ~0.4 MiB total) — NOT the streamed tensor.
    w1_bf16 = w1.astype(jnp.bfloat16)                     # [768, 256]
    w2_row = w2.reshape(1, H_MLP).astype(jnp.float32)     # [1, 256] for the VPU 2nd layer
    b1_f32 = b1.reshape(1, H_MLP).astype(jnp.float32)
    b2_f32 = b2.reshape(1, H_OUT).astype(jnp.float32)

    grid = (B // batch_tile, S // seq_tile)

    hs_spec = pl.BlockSpec((batch_tile, seq_tile, H_BERT), lambda b, s: (b, s, 0))
    # Constant index_map -> weights stay resident in VMEM across all grid steps.
    pinned = lambda shape: pl.BlockSpec(shape, lambda b, s: (0, 0))

    kernel = functools.partial(essay_scorer_kernel, seq_len=float(S))

    # VMEM limit sized from the actual footprint; >=32 MiB so v5e's 16 MiB
    # scoped default never bites when tiles are grown.
    h_tile_bytes = batch_tile * seq_tile * H_BERT * itemsize
    weight_bytes = (w1_bf16.size * 2
                    + (b1_f32.size + w2_row.size + b2_f32.size) * 4)
    vmem_limit = min(100 * 1024 * 1024,
                     max(32 * 1024 * 1024,
                         int(2.5 * h_tile_bytes) + 2 * weight_bytes
                         + 4 * 1024 * 1024))

    cost = pl.CostEstimate(
        flops=B * S * H_BERT                      # streaming seq-sum
              + 2 * B * H_BERT * H_MLP            # Linear(768,256)
              + 4 * B * H_MLP,                    # ReLU + Linear(256,1)
        transcendentals=0,
        bytes_accessed=(hidden_states.size * itemsize
                        + w1_bf16.size * 2
                        + (b1_f32.size + w2_row.size + b2_f32.size) * 4
                        + B * H_OUT * 4),
    )

    return pl.pallas_call(
        kernel,
        out_shape=jax.ShapeDtypeStruct((B, H_OUT), jnp.float32),
        grid_spec=pltpu.PrefetchScalarGridSpec(
            num_scalar_prefetch=0,
            grid=grid,
            in_specs=[
                hs_spec,
                pinned((H_BERT, H_MLP)),   # w1 (bf16)
                pinned((1, H_MLP)),        # b1
                pinned((1, H_MLP)),        # w2 row
                pinned((1, H_OUT)),        # b2
            ],
            out_specs=pl.BlockSpec((batch_tile, H_OUT), lambda b, s: (b, 0)),
            scratch_shapes=[pltpu.VMEM((batch_tile, H_BERT), jnp.float32)],
        ),
        compiler_params=pltpu.CompilerParams(
            # Batch axis parallel (v7x dual-TC sharding); seq is the reduction
            # axis carrying the accumulator -> must stay "arbitrary" & last.
            dimension_semantics=("parallel", "arbitrary"),
            vmem_limit_bytes=vmem_limit,
        ),
        cost_estimate=cost,
    )(hidden_states, w1_bf16, b1_f32, w2_row, b2_f32)


def simulated_bert_last_hidden_state(input_ids, attention_mask, emb_table):
    """Deterministic stand-in for bert(...).last_hidden_state (plain-JAX glue).

    Emits the producer's native dtype (bf16 here) so the [B, S, 768] stream
    never takes an extra HBM cast pass before the Pallas kernel.
    """
    h = emb_table[input_ids]                                  # [B, S, 768]
    return h * attention_mask[..., None].astype(h.dtype)      # [B, S, 768]


if __name__ == "__main__":
    B, S, VOCAB = 2, 32, 64

    key = jax.random.PRNGKey(0)
    k_ids, k_emb, k_w1, k_b1, k_w2, k_b2 = jax.random.split(key, 6)

    # Inputs (as the PyTorch forward would receive them).
    input_ids = jax.random.randint(k_ids, (B, S), 0, VOCAB, dtype=jnp.int32)
    attention_mask = jnp.ones((B, S), dtype=jnp.int32)

    # Deterministic parameters. The "BERT" embedding table is bf16 so the
    # producer emits the streamed tensor in bf16 directly (no wrapper cast).
    emb_table = (jax.random.normal(k_emb, (VOCAB, H_BERT), dtype=jnp.float32)
                 * 0.02).astype(jnp.bfloat16)
    w1 = jax.random.normal(k_w1, (H_BERT, H_MLP), dtype=jnp.float32) * 0.02
    b1 = jax.random.normal(k_b1, (1, H_MLP), dtype=jnp.float32) * 0.02
    w2 = jax.random.normal(k_w2, (H_MLP, H_OUT), dtype=jnp.float32) * 0.02
    b2 = jax.random.normal(k_b2, (1, H_OUT), dtype=jnp.float32) * 0.02

    # "BERT" output (glue, plain JAX) — bf16 [B, S, 768].
    hidden_states = simulated_bert_last_hidden_state(input_ids, attention_mask, emb_table)

    # Pallas kernel: grid = (1 batch tile, 2 seq tiles) at these shapes, so both
    # the accumulator init and finalize paths are exercised. seq_tile=16
    # respects bf16 sublane packing (multiple of 16).
    scores = essay_scorer_forward(hidden_states, w1, b1, w2, b2,
                                  batch_tile=2, seq_tile=16)
    scores = jax.block_until_ready(scores)

    # Pure-JAX reference matching the kernel's precision choices
    # (bf16 stream / bf16 MXU operands, f32 accumulation).
    h_ref = hidden_states.astype(jnp.float32)
    pooled_ref = h_ref.mean(axis=1)                                    # [B, 768]
    z1_ref = jnp.dot(pooled_ref.astype(jnp.bfloat16), w1.astype(jnp.bfloat16),
                     preferred_element_type=jnp.float32) + b1
    a1_ref = jnp.maximum(z1_ref, 0.0)
    ref = jnp.sum(a1_ref * w2.reshape(1, H_MLP), axis=-1, keepdims=True) + b2

    assert scores.shape == (B, 1)
    assert jnp.allclose(scores, ref, atol=1e-4, rtol=1e-3), (scores, ref)

    print("KERNEL_OK")
</pallas_src>

<mosaic_0001>
module attributes {stable_mosaic.version = 11 : i64} {
  func.func @essay_scorer_kernel(%arg0: i32, %arg1: i32, %arg2: memref<2x16x768xbf16, #tpu.memory_space<vmem>>, %arg3: memref<768x256xbf16, #tpu.memory_space<vmem>>, %arg4: memref<1x256xf32, #tpu.memory_space<vmem>>, %arg5: memref<1x256xf32, #tpu.memory_space<vmem>>, %arg6: memref<1x1xf32, #tpu.memory_space<vmem>>, %arg7: memref<2x1xf32, #tpu.memory_space<vmem>>, %arg8: memref<2x768xf32, #tpu.memory_space<vmem>>) attributes {dimension_semantics = [#tpu.dimension_semantics<parallel>, #tpu.dimension_semantics<arbitrary>], iteration_bounds = array<i64: 1, 2>, scalar_prefetch = 0 : i64, scratch_operands = 1 : i64, tpu.core_type = #tpu.core_type<tc>, window_params = [{transform_indices = @transform_0, window_bounds = array<i64: 2, 16, 768>}, {pipeline_mode = #tpu.pipeline_mode<synchronous>, transform_indices = @transform_1, window_bounds = array<i64: 768, 256>}, {pipeline_mode = #tpu.pipeline_mode<synchronous>, transform_indices = @transform_2, window_bounds = array<i64: 1, 256>}, {pipeline_mode = #tpu.pipeline_mode<synchronous>, transform_indices = @transform_3, window_bounds = array<i64: 1, 256>}, {pipeline_mode = #tpu.pipeline_mode<synchronous>, transform_indices = @transform_4, window_bounds = array<i64: 1, 1>}, {transform_indices = @transform_5, window_bounds = array<i64: 2, 1>}]} {
    %c0_i32 = arith.constant 0 : i32
    %0 = arith.cmpi eq, %arg1, %c0_i32 : i32
    %1 = arith.extui %0 : i1 to i32
    %c0_i32_0 = arith.constant 0 : i32
    %2 = arith.cmpi ne, %1, %c0_i32_0 : i32
    scf.if %2 {
      %cst_8 = arith.constant 0.000000e+00 : f32
      %12 = vector.broadcast %cst_8 : f32 to vector<2x768xf32>
      %c0_9 = arith.constant 0 : index
      %c0_10 = arith.constant 0 : index
      %13 = vector.load %arg8[%c0_9, %c0_10] : memref<2x768xf32, #tpu.memory_space<vmem>>, vector<2x768xf32>
      tpu.vector_store %arg8[%c0_9, %c0_10], %12 {strides = array<i32>} : memref<2x768xf32, #tpu.memory_space<vmem>>, vector<2x768xf32>,
    } else {
    }
    %c0 = arith.constant 0 : index
    %c0_1 = arith.constant 0 : index
    %3 = vector.load %arg8[%c0, %c0_1] : memref<2x768xf32, #tpu.memory_space<vmem>>, vector<2x768xf32>
    %c0_2 = arith.constant 0 : index
    %c0_3 = arith.constant 0 : index
    %c0_4 = arith.constant 0 : index
    %4 = vector.load %arg2[%c0_2, %c0_3, %c0_4] : memref<2x16x768xbf16, #tpu.memory_space<vmem>>, vector<2x16x768xbf16>
    %5 = arith.extf %4 : vector<2x16x768xbf16> to vector<2x16x768xf32>
    %cst = arith.constant dense<0.000000e+00> : vector<2x768xf32>
    %6 = vector.multi_reduction <add>, %5, %cst [1] : vector<2x16x768xf32> to vector<2x768xf32>
    %7 = arith.addf %3, %6 : vector<2x768xf32>
    %c0_5 = arith.constant 0 : index
    %c0_6 = arith.constant 0 : index
    %8 = vector.load %arg8[%c0_5, %c0_6] : memref<2x768xf32, #tpu.memory_space<vmem>>, vector<2x768xf32>
    tpu.vector_store %arg8[%c0_5, %c0_6], %7 {strides = array<i32>} : memref<2x768xf32, #tpu.memory_space<vmem>>, vector<2x768xf32>,
    %c1_i32 = arith.constant 1 : i32
    %9 = arith.cmpi eq, %arg1, %c1_i32 : i32
    %10 = arith.extui %9 : i1 to i32
    %c0_i32_7 = arith.constant 0 : i32
    %11 = arith.cmpi ne, %10, %c0_i32_7 : i32
    scf.if %11 {
      %c0_8 = arith.constant 0 : index
      %c0_9 = arith.constant 0 : index
      %12 = vector.load %arg8[%c0_8, %c0_9] : memref<2x768xf32, #tpu.memory_space<vmem>>, vector<2x768xf32>
      %cst_10 = arith.constant 3.125000e-02 : f32
      %13 = vector.broadcast %cst_10 : f32 to vector<2x768xf32>
      %14 = arith.mulf %12, %13 : vector<2x768xf32>
      %15 = arith.truncf %14 : vector<2x768xf32> to vector<2x768xbf16>
      %c0_11 = arith.constant 0 : index
      %c0_12 = arith.constant 0 : index
      %16 = vector.load %arg3[%c0_11, %c0_12] : memref<768x256xbf16, #tpu.memory_space<vmem>>, vector<768x256xbf16>
      %cst_13 = arith.constant dense<0.000000e+00> : vector<2x256xf32>
      %17 = tpu.matmul %15, %16, %cst_13 {dimension_numbers = #tpu.dot_dimension_numbers<[1], [0], [0], [1], [0, 0, 1, 1], [], []>} : vector<2x768xbf16>, vector<768x256xbf16>, vector<2x256xf32> -> vector<2x256xf32>
      %c0_14 = arith.constant 0 : index
      %c0_15 = arith.constant 0 : index
      %18 = vector.load %arg4[%c0_14, %c0_15] : memref<1x256xf32, #tpu.memory_space<vmem>>, vector<1x256xf32>
      %19 = vector.broadcast %18 : vector<1x256xf32> to vector<2x256xf32>
      %20 = arith.addf %17, %19 : vector<2x256xf32>
      %cst_16 = arith.constant 0.000000e+00 : f32
      %21 = vector.broadcast %cst_16 : f32 to vector<2x256xf32>
      %22 = arith.maximumf %20, %21 : vector<2x256xf32>
      %c0_17 = arith.constant 0 : index
      %c0_18 = arith.constant 0 : index
      %23 = vector.load %arg5[%c0_17, %c0_18] : memref<1x256xf32, #tpu.memory_space<vmem>>, vector<1x256xf32>
      %24 = vector.broadcast %23 : vector<1x256xf32> to vector<2x256xf32>
      %25 = arith.mulf %22, %24 : vector<2x256xf32>
      %cst_19 = arith.constant dense<0.000000e+00> : vector<2xf32>
      %26 = vector.multi_reduction <add>, %25, %cst_19 [1] : vector<2x256xf32> to vector<2xf32>
      %27 = vector.shape_cast %26 : vector<2xf32> to vector<2x1xf32>
      %c0_20 = arith.constant 0 : index
      %c0_21 = arith.constant 0 : index
      %28 = vector.load %arg6[%c0_20, %c0_21] : memref<1x1xf32, #tpu.memory_space<vmem>>, vector<1x1xf32>
      %29 = vector.broadcast %28 : vector<1x1xf32> to vector<2x1xf32>
      %30 = arith.addf %27, %29 : vector<2x1xf32>
      %c0_22 = arith.constant 0 : index
      %c0_23 = arith.constant 0 : index
      %31 = vector.load %arg7[%c0_22, %c0_23] : memref<2x1xf32, #tpu.memory_space<vmem>>, vector<2x1xf32>
      tpu.vector_store %arg7[%c0_22, %c0_23], %30 {strides = array<i32>} : memref<2x1xf32, #tpu.memory_space<vmem>>, vector<2x1xf32>,
    } else {
    }
    return
  }
  func.func @transform_0(%arg0: i32, %arg1: i32) -> (i32, i32, i32) {
    %c0_i32 = arith.constant 0 : i32
    %c0_i32_0 = arith.constant 0 : i32
    return %arg0, %arg1, %c0_i32 : i32, i32, i32
  }
  func.func @transform_1(%arg0: i32, %arg1: i32) -> (i32, i32) {
    %c0_i32 = arith.constant 0 : i32
    %c0_i32_0 = arith.constant 0 : i32
    %c0_i32_1 = arith.constant 0 : i32
    return %c0_i32, %c0_i32_0 : i32, i32
  }
  func.func @transform_2(%arg0: i32, %arg1: i32) -> (i32, i32) {
    %c0_i32 = arith.constant 0 : i32
    %c0_i32_0 = arith.constant 0 : i32
    %c0_i32_1 = arith.constant 0 : i32
    return %c0_i32, %c0_i32_0 : i32, i32
  }
  func.func @transform_3(%arg0: i32, %arg1: i32) -> (i32, i32) {
    %c0_i32 = arith.constant 0 : i32
    %c0_i32_0 = arith.constant 0 : i32
    %c0_i32_1 = arith.constant 0 : i32
    return %c0_i32, %c0_i32_0 : i32, i32
  }
  func.func @transform_4(%arg0: i32, %arg1: i32) -> (i32, i32) {
    %c0_i32 = arith.constant 0 : i32
    %c0_i32_0 = arith.constant 0 : i32
    %c0_i32_1 = arith.constant 0 : i32
    return %c0_i32, %c0_i32_0 : i32, i32
  }
  func.func @transform_5(%arg0: i32, %arg1: i32) -> (i32, i32) {
    %c0_i32 = arith.constant 0 : i32
    %c0_i32_0 = arith.constant 0 : i32
    return %arg0, %c0_i32 : i32, i32
  }
}

</mosaic_0001>

<bundles_post_ra>
// kernel: tpu_custom_call.1
= control target key start
LH: loop header
LB: loop body
LE: loop exit
PB: predicated region body
PF: predicated region fallthrough
CT: control target
= control target key end

     0   :  { %s2064_s0 = inlined_call_operand.hbm [shape: bf16[2,32,768], index: 0, kind: input, shape index: {}]   ;;  %s2065_s1 = inlined_call_operand.hbm [shape: bf16[768,256], index: 1, kind: input, shape index: {}]   ;;  %s2066_s2 = inlined_call_operand.vmem [shape: f32[1,256], index: 2, kind: input, shape index: {}]   ;;  %s2067_s3 = inlined_call_operand.vmem [shape: f32[1,256], index: 3, kind: input, shape index: {}]   ;;  %s2068_s4 = inlined_call_operand.<no memory space> [shape: f32[1,1], index: 4, kind: input, shape index: {}]   ;;  %s2069_s5 = inlined_call_operand.vmem [shape: f32[2,1], index: 5, kind: output, shape index: {}]  }
   0x1   :  { %v10_v0 = vstv %s2068_s4 }
   0x2   :  { %11 = vst [vmem:[#allocation3] sm:$0x1] %v10_v0 }
   0x3   :  { %12 = vsyncpa [#allocation5], 0 }
   0x4   :  { %14 = vsyncpa [#allocation5 + $0x1], 0 }
   0x5   :  { %15 = vsyncpa [#allocation7], 0  ;;  %s1868_s20 = smov 0   ;;  %s1870_s21 = smov 0  }
   0x6   :  { %s1872_s22 = smov 0   ;;  %s1874_s23 = smov 0  }
   0x7   :  { %s1876_s24 = smov 0   ;;  %s1878_s25 = smov 0  }
   0x8 LB: > { %s1394_s4 = sadd.s32 4294967295, %s1822_s25   ;;  %s30_s26 = sadd.s32 1, %s1818_s24  ;;  %s1822_s25 = sphi %s1878_s25, %s21_s25   ;;  %s1818_s24 = sphi %s1876_s24, %s2088_s24   ;;  %s1814_s23 = sphi %s1874_s23, %s2087_s23   ;;  %s1810_s22 = sphi %s1872_s22, %s2086_s22   ;;  %s1806_s21 = sphi %s1870_s21, %s2085_s21   ;;  %s1802_s20 = sphi %s1868_s20, %s2084_s20  }
   0x9   : > { %p31_p0 = scmp.ge.s32.totalorder %s30_s26, 2  ;;  %s42_s27 = sadd.s32 1, %s1810_s22 }
   0xa   : > { %p49_p1 = scmp.ne.s32.totalorder %s1810_s22, %s1806_s21  ;;  %p50_p2 = scmp.eq.s32.totalorder %s1822_s25, 0 }
   0xb   : > { %s2090_s26 = smov (%p31_p0, %s30_s26), 0  ;;  %p55_p4 = scmp.ne.s32.totalorder %s1806_s21, %s1802_s20 }
   0xc   : > { %p1904_p3 = por %p50_p2, %p49_p1  ;;  %s38_s29 = ssub.s32 %s1818_s24, %s2090_s26 }
   0xd   : > { %p1911_p5 = scmp.eq.s32.totalorder %s1394_s4, 0  ;;  %p40_p6 = scmp.eq.s32.totalorder %s38_s29, 0 }
   0xe   : > { %s2075_s28 = scalar_select %p1904_p3, 1, 0 }
   0xf   : > { %s2076_s30 = scalar_select %p1911_p5, 1, 0 }
  0x10   : > { %p1395_p7 = scmp.ge.s32.totalorder %s1822_s25, 1  ;;  %p1918_p8 = por %p1911_p5, %p55_p4 }
  0x11   : > { %p176_p9 = scmp.lt.s32.totalorder %s1822_s25, 3  ;;  %s1824_s9 = smov [#allocation6]  }
  0x12   : > { %s2077_s6 = scalar_select %p1918_p8, 1, 0 }
  0x13   : > { %s1924_s7 = scalar_select %p40_p6, %s1810_s22, %s42_s27  }
  0x14   : > { %p1926_p10 = pnand %p1395_p7, %p176_p9  ;;  %s188_s10 = sshll.u32 %s1824_s9, 4  ;;  %s189_s10 = int_to_ptr.vmem [resolvable:$true] %s188_s10 }
  0x15   : > { %s1740_s14 = scalar_lea.hbm %s2065_s1, 12288 }
  0x16   : > { %s2078_s8 = scalar_select %p1926_p10, 1, 0 }
  0x17   : > { %p1531_p11 = pneg %p1926_p10  ;;  %p1741_p13 = scmp.ne.s32.totalorder %s2065_s1, %s1740_s14 }
  0x18   : > { %p1747_p4 = scmp.lt.u32.totalorder %s1740_s14, %s2065_s1 }
  0x19   : > { %p1934_p12 = pnand %p1531_p11, %p1911_p5 }
  0x1b   : > { %p1742_p0 = pneg %p1934_p12 }
  0x1d   : > { %p1743_p1 = pnand %p1742_p0, %p1741_p13 }
  0x1f   : > { %p1744_p2 = pneg %p1743_p1 }
  0x21   : > { %p1749_p6 = pnand %p1747_p4, %p1744_p2 }
  0x23   : > { %1752 = shalt.err (!%p1749_p6)
}
  0x24   : > { %s1753_s19 = scalar_lea.vmem %s189_s10, 12288  ;;  %p1761_p5 = scmp.lt.s32.totalorder %s189_s10, %s189_s10 }
  0x25   : > { %p1754_p7 = scmp.ne.s32.totalorder %s189_s10, %s1753_s19  ;;  %p1762_p8 = scmp.lt.s32.totalorder %s1753_s19, %s1753_s19 }
  0x27   : > { %p1756_p9 = pnand %p1754_p7, %p1742_p0  ;;  %p1763_p10 = por %p1762_p8, %p1761_p5 }
  0x29   : > { %p1757_p11 = pneg %p1756_p9 }
  0x2b   : > { %p1764_p3 = pnand %p1763_p10, %p1757_p11 }
  0x2d   : > { %1767 = shalt.err (!%p1764_p3)
}
  0x2e   : > { %s1825_s20 = smov 128   ;;  %s1826_s4 = smov 8  }
  0x2f   : > { %1534 = dma.hbm_to_vmem [thread:$0]  (!%p1934_p12), %s2065_s1, 12288, %s189_s10, [#allocation7], %s1825_s20, %s1825_s20, %s1826_s4  }
  0x30   : > { %p1397_p13 = scmp.ge.s32.totalorder %s1822_s25, 2 }
  0x32   : > { %207 = sbr.rel (%p1397_p13) target bundleno = 73 (0x49), region = 32 }
  0x39   : > { %s211_s9 = sand.u32 1, %s1810_s22   ;;  %s1516_s12 = smul.u32 768, %s1818_s24 }
  0x3a   : > { %s1515_s13 = smul.u32 96, %s211_s9  ;;  %s1827_s14 = smov 1536  }
  0x3b   : > { %p2080_p3 = scmp.ne.s32.totalorder %s2075_s28, 0  ;;  %s225_s16 = scalar_lea.hbm %s2064_s0, %s1516_s12 }
  0x3c   : > { %s215_s18 = scalar_lea.vmem [#allocation4], %s1515_s13  ;;  %s1828_s20 = smov 768  }
  0x3d   : > { %1521 = sst [smem:[#allocation9]] (%p2080_p3), %s1827_s14  ;;  %s238_s19 = sshll.u32 %s215_s18, 4  ;;  %s239_s19 = int_to_ptr.vmem [resolvable:$true] %s238_s19 }
  0x3e   : > { %s1520_s10 = scalar_select %p2080_p3, [#allocation0], [#allocation10] }
  0x3f   : > { %1522 = sst [smem:[#allocation9 + $0x1]] (%p2080_p3), %s1828_s20  ;;  %s1829_s4 = smov 2  }
  0x40   : > { %s230_s17 = sld [smem:[%s1520_s10]]   ;;  %s1830_s27 = smov 384  }
  0x41   : > { %1523 = sst [smem:[#allocation9 + $0x2]] (%p2080_p3), %s1829_s4  ;;  %s1831_s29 = smov 24  }
  0x42   : > { %1524 = sst [smem:[#allocation9 + $0x3]] (%p2080_p3), %s1830_s27  ;;  %s212_s13 = scalar_lea.sflag [#allocation5], %s211_s9 }
  0x43   : > { %1525 = sst [smem:[#allocation9 + $0x4]] (%p2080_p3), %s1830_s27  ;;  %s1832_s10 = smov [#allocation8]  }
  0x44   : > { %1526 = sst [smem:[#allocation9 + $0x5]] (%p2080_p3), %s1831_s29 }
  0x46   : > { %s1401_s12 = sshll.u32 %s230_s17, 26 }
  0x47   : > { %s1402_s14 = sadd.s32 134217728, %s1401_s12 }
  0x48   : > { %1527 = dma.general (%p2080_p3), %s225_s16, 1536, %s239_s19, %s212_s13, %s1832_s10, [#allocation9], %s1402_s14, 0  }
  0x49 PF: > { %p2081_p5 = scmp.ne.s32.totalorder %s2078_s8, 0 }
  0x4a   : > { %s265_s11 = sand.u32 (!%p2081_p5), 1, %s1806_s21   ;;  %p2082_p8 = scmp.ne.s32.totalorder (!%p2081_p5), %s2077_s6, 0 }
  0x4b   : > { %263 = sbr.rel (%p2081_p5) target bundleno = 616 (0x268), region = 40  ;;  %s266_s18 = scalar_lea.sflag (!%p2081_p5), [#allocation5], %s265_s11 }
  0x4c   : > { %s1517_s15 = smul.u32 (!%p2081_p5), 96, %s265_s11 }
  0x4e   : > { %s1979_s20 = scalar_lea.vmem (!%p2081_p5), [#allocation4], %s1517_s15 }
  0x52   : > { %1793 = dma.done.wait (%p2082_p8), %s266_s18, 1536  }
  0x53   : > { %1795 = vsyncadd (%p2082_p8), %s266_s18, 4294965760  ;;  %p2083_p10 = scmp.ne.s32.totalorder %s2076_s30, 0 }
  0x55   : > { %1797 = dma.done.wait (%p2083_p10), [#allocation7], 12288  }
  0x56   : > { %1799 = vsyncadd (%p2083_p10), [#allocation7], 4294955008  ;;  %p1405_p12 = scmp.ne.s32.totalorder %s1814_s23, 0 }
  0x57   : > { %v1833_v1 = vmov (!%p1405_p12), 0.0  }
  0x58   : > { %308 = sbr.rel (%p1405_p12) target bundleno = 95 (0x5f), region = 52  ;;  %309 = vst [vmem:[#allocation2] sm:$0xff] (!%p1405_p12), %v1833_v1  ;;  %310 = vst [vmem:[#allocation2 + $0x8] sm:$0xf] (!%p1405_p12), %v1833_v1 }
  0x5f PF: > { %v313_v2 = vld [vmem:[%s1979_s20] sm:$0xff]  ;;  %v314_v3 = vld [vmem:[%s1979_s20 + $0x8] sm:$0xff]  ;;  %v315_v4 = vld [vmem:[%s1979_s20 + $0x10] sm:$0xff]  ;;  %vm500_vm0 = vcmask 1041409   ;;  %vm502_vm1 = vcmask 1043459   ;;  %vm504_vm2 = vcmask 1045509  }
  0x60   : > { %v316_v5 = vld [vmem:[%s1979_s20 + $0x18] sm:$0xff]  ;;  %v317_v6 = vld [vmem:[%s1979_s20 + $0x20] sm:$0xff]  ;;  %v318_v7 = vld [vmem:[%s1979_s20 + $0x28] sm:$0xff]  ;;  %v325_v9 = vunpack.c.l.bf16 %v313_v2  ;;  %v326_v10 = vunpack.c.h.bf16 %v313_v2  ;;  %v327_v11 = vunpack.c.l.bf16 %v314_v3  ;;  %v328_v12 = vunpack.c.h.bf16 %v314_v3  ;;  %p1406_p0 = scmp.ne.s32.totalorder %s1814_s23, 1 }
  0x61   : > { %v319_v8 = vld [vmem:[%s1979_s20 + $0x30] sm:$0xff]  ;;  %v322_v13 = vld [vmem:[%s1979_s20 + $0x48] sm:$0xff]  ;;  %v329_v14 = vunpack.c.l.bf16 %v315_v4  ;;  %v330_v15 = vunpack.c.h.bf16 %v315_v4  ;;  %v331_v16 = vunpack.c.l.bf16 %v316_v5  ;;  %v332_v17 = vunpack.c.h.bf16 %v316_v5  ;;  %v320_v40 = vld [vmem:[%s1979_s20 + $0x38] sm:$0xff] }
  0x62   : > { %v333_v18 = vunpack.c.l.bf16 %v317_v6  ;;  %v334_v19 = vunpack.c.h.bf16 %v317_v6  ;;  %v335_v20 = vunpack.c.l.bf16 %v318_v7  ;;  %v336_v21 = vunpack.c.h.bf16 %v318_v7  ;;  %v321_v49 = vld [vmem:[%s1979_s20 + $0x40] sm:$0xff]  ;;  %v323_v54 = vld [vmem:[%s1979_s20 + $0x50] sm:$0xff]  ;;  %v324_v59 = vld [vmem:[%s1979_s20 + $0x58] sm:$0xff] }
  0x63   : > { %v337_v22 = vunpack.c.l.bf16 %v319_v8  ;;  %v338_v23 = vunpack.c.h.bf16 %v319_v8  ;;  %v343_v24 = vunpack.c.l.bf16 %v322_v13  ;;  %v344_v25 = vunpack.c.h.bf16 %v322_v13 }
  0x64   : > { %v349_v26 = vadd.f32 %v331_v16, %v325_v9  ;;  %v356_v27 = vadd.f32 %v332_v17, %v326_v10  ;;  %v363_v28 = vadd.f32 %v333_v18, %v327_v11  ;;  %v370_v29 = vadd.f32 %v334_v19, %v328_v12 }
  0x65   : > { %v377_v30 = vadd.f32 %v335_v20, %v329_v14  ;;  %v384_v31 = vadd.f32 %v336_v21, %v330_v15  ;;  %v391_v34 = vadd.f32 %v343_v24, %v337_v22  ;;  %v398_v35 = vadd.f32 %v344_v25, %v338_v23 }
  0x66   : > { %v350_v32 = vrot.slane %v349_v26, 4  ;;  %v357_v33 = vrot.slane %v356_v27, 4  ;;  %v364_v36 = vrot.slane %v363_v28, 4  ;;  %v371_v37 = vrot.slane %v370_v29, 4 }
  0x67   : > { %v378_v38 = vrot.slane %v377_v30, 4  ;;  %v385_v39 = vrot.slane %v384_v31, 4  ;;  %v392_v43 = vrot.slane %v391_v34, 4  ;;  %v399_v44 = vrot.slane %v398_v35, 4 }
  0x68   : > { %v351_v41 = vadd.f32 %v350_v32, %v349_v26  ;;  %v358_v42 = vadd.f32 %v357_v33, %v356_v27  ;;  %v365_v45 = vadd.f32 %v364_v36, %v363_v28  ;;  %v372_v46 = vadd.f32 %v371_v37, %v370_v29 }
  0x69   : > { %v379_v47 = vadd.f32 %v378_v38, %v377_v30  ;;  %v386_v48 = vadd.f32 %v385_v39, %v384_v31  ;;  %v393_v52 = vadd.f32 %v392_v43, %v391_v34  ;;  %v400_v53 = vadd.f32 %v399_v44, %v398_v35 }
  0x6a   : > { %v352_v50 = vrot.slane %v351_v41, 2  ;;  %v359_v51 = vrot.slane %v358_v42, 2  ;;  %v339_v55 = vunpack.c.l.bf16 %v320_v40  ;;  %v340_v56 = vunpack.c.h.bf16 %v320_v40 }
  0x6b   : > { %v366_v57 = vrot.slane %v365_v45, 2  ;;  %v373_v58 = vrot.slane %v372_v46, 2  ;;  %v380_v60 = vrot.slane %v379_v47, 2  ;;  %v387_v61 = vrot.slane %v386_v48, 2 }
  0x6c   : > { %v394_v62 = vrot.slane %v393_v52, 2  ;;  %v401_v63 = vrot.slane %v400_v53, 2  ;;  %v341_v0 = vunpack.c.l.bf16 %v321_v49  ;;  %v342_v1 = vunpack.c.h.bf16 %v321_v49 }
  0x6d   : > { %v353_v2 = vadd.f32 %v352_v50, %v351_v41  ;;  %v360_v3 = vadd.f32 %v359_v51, %v358_v42  ;;  %v345_v4 = vunpack.c.l.bf16 %v323_v54  ;;  %v346_v5 = vunpack.c.h.bf16 %v323_v54 }
  0x6e   : > { %v367_v6 = vadd.f32 %v366_v57, %v365_v45  ;;  %v374_v7 = vadd.f32 %v373_v58, %v372_v46  ;;  %v347_v8 = vunpack.c.l.bf16 %v324_v59  ;;  %v348_v9 = vunpack.c.h.bf16 %v324_v59 }
  0x6f   : > { %v395_v10 = vadd.f32 %v394_v62, %v393_v52  ;;  %v402_v11 = vadd.f32 %v401_v63, %v400_v53  ;;  %v381_v12 = vadd.f32 %v380_v60, %v379_v47  ;;  %v388_v13 = vadd.f32 %v387_v61, %v386_v48 }
  0x70   : > { %v354_v14 = vrot.slane %v353_v2, 1  ;;  %v361_v15 = vrot.slane %v360_v3, 1  ;;  %v1834_v16 = vmov 1983009808   ;;  %v450_v18 = vlaneseq }
  0x71   : > { %v448_v17 = vunpack.c.l.s4 %v1834_v16  ;;  %v368_v19 = vrot.slane %v367_v6, 1  ;;  %v375_v20 = vrot.slane %v374_v7, 1  ;;  %v405_v21 = vadd.f32 %v345_v4, %v339_v55 }
  0x72   : > { %v412_v22 = vadd.f32 %v346_v5, %v340_v56  ;;  %v396_v23 = vrot.slane %v395_v10, 1  ;;  %v403_v24 = vrot.slane %v402_v11, 1  ;;  %v419_v25 = vadd.f32 %v347_v8, %v341_v0 }
  0x73   : > { %v426_v26 = vadd.f32 %v348_v9, %v342_v1  ;;  %v382_v27 = vrot.slane %v381_v12, 1  ;;  %v389_v28 = vrot.slane %v388_v13, 1  ;;  %v406_v29 = vrot.slane %v405_v21, 4 }
  0x74   : > { %v413_v30 = vrot.slane %v412_v22, 4  ;;  %v355_v31 = vadd.f32 %v354_v14, %v353_v2  ;;  %v362_v32 = vadd.f32 %v361_v15, %v360_v3  ;;  %v420_v33 = vrot.slane %v419_v25, 4 }
  0x75   : > { %v427_v34 = vrot.slane %v426_v26, 4  ;;  %v369_v35 = vadd.f32 %v368_v19, %v367_v6  ;;  %v376_v36 = vadd.f32 %v375_v20, %v374_v7  ;;  %v407_v37 = vadd.f32 %v406_v29, %v405_v21  ;;  %v311_v20 = vld [vmem:[#allocation2] sm:$0xff]  ;;  %v1598_v29 = vld [vmem:[#allocation6 + $0x100] ss:$8 sps:$4 sm:$0xff] (!%p1406_p0)  }
  0x76   : > { %v414_v38 = vadd.f32 %v413_v30, %v412_v22  ;;  %v397_v39 = vadd.f32 %v396_v23, %v395_v10  ;;  %v404_v40 = vadd.f32 %v403_v24, %v402_v11  ;;  %v421_v41 = vadd.f32 %v420_v33, %v419_v25  ;;  %v1599_v30 = vld [vmem:[#allocation6 + $0x114] ss:$8 sps:$4 sm:$0xff] (!%p1406_p0)   ;;  %v1604_v33 = vld [vmem:[#allocation6 + $0x120] ss:$8 sps:$4 sm:$0xff] (!%p1406_p0)  }
  0x77   : > { %v428_v42 = vadd.f32 %v427_v34, %v426_v26  ;;  %v408_v43 = vrot.slane %v407_v37, 2  ;;  %v449_v45 = vunpack.c.0.s8 %v448_v17  ;;  %v2002_v46 = vshrl.u32 %v450_v18, 7  ;;  %v312_v17 = vld [vmem:[#allocation2 + $0x8] sm:$0xf] }
  0x78   : > { %v415_v44 = vrot.slane %v414_v38, 2  ;;  %v422_v47 = vrot.slane %v421_v41, 2  ;;  %v383_v49 = vadd.f32 %v382_v27, %v381_v12  ;;  %v390_v50 = vadd.f32 %v389_v28, %v388_v13  ;;  %v1596_v28 = vld [vmem:[#allocation6 + $0x104] ss:$8 sps:$4 sm:$0xff] (!%p1406_p0)   ;;  %v1605_v34 = vld [vmem:[#allocation6 + $0x134] ss:$8 sps:$4 sm:$0xff] (!%p1406_p0)  }
  0x79   : > { %v429_v48 = vrot.slane %v428_v42, 2  ;;  %v409_v51 = vadd.f32 %v408_v43, %v407_v37  ;;  %v445_v55 = vcombine.low %v355_v31, %v362_v32  ;;  %v446_v56 = vcombine.low %v369_v35, %v376_v36  ;;  %1197 = vmatprep.subr.bf16.mxu0 (!%p1406_p0), %v1596_v28  ;;  %v1601_v31 = vld [vmem:[#allocation6 + $0x110] ss:$8 sps:$4 sm:$0xff] (!%p1406_p0)   ;;  %v1602_v32 = vld [vmem:[#allocation6 + $0x124] ss:$8 sps:$4 sm:$0xff] (!%p1406_p0)  }
  0x7a   : > { %v416_v52 = vadd.f32 %v415_v44, %v414_v38  ;;  %v423_v53 = vadd.f32 %v422_v47, %v421_v41  ;;  %v2005_v59 = vsub.s32 %v449_v45, %v2002_v46  ;;  %v470_v60 = vcombine.low %v397_v39, %v404_v40  ;;  %1198 = vmatpush1.bf16.msra.mxu0 (!%p1406_p0), %v1598_v29  ;;  %v1607_v35 = vld [vmem:[#allocation6 + $0x130] ss:$8 sps:$4 sm:$0xff] (!%p1406_p0)   ;;  %v1608_v36 = vld [vmem:[#allocation6 + $0x144] ss:$8 sps:$4 sm:$0xff] (!%p1406_p0)   ;;  %v1610_v37 = vld [vmem:[#allocation6 + $0x140] ss:$8 sps:$4 sm:$0xff] (!%p1406_p0)  }
  0x7b   : > { %v430_v54 = vadd.f32 %v429_v48, %v428_v42  ;;  %v410_v57 = vrot.slane %v409_v51, 1  ;;  %v462_v3 = vcombine.low %v383_v49, %v390_v50  ;;  %vm506_vm3 = vcmask 1047559   ;;  %1199 = vmatprep.subr.bf16.mxu0 (!%p1406_p0), %v1599_v30  ;;  %v1611_v38 = vld [vmem:[#allocation6 + $0x154] ss:$8 sps:$4 sm:$0xff] (!%p1406_p0)   ;;  %v1613_v39 = vld [vmem:[#allocation6 + $0x150] ss:$8 sps:$4 sm:$0xff] (!%p1406_p0)  }
  0x7c   : > { %v417_v58 = vrot.slane %v416_v52, 1  ;;  %v424_v61 = vrot.slane %v423_v53, 1  ;;  %v453_v4 = vrot.slane %v445_v55, %v2005_v59  ;;  %v460_v5 = vrot.slane %v446_v56, %v2005_v59  ;;  %v1614_v40 = vld [vmem:[#allocation6 + $0x164] ss:$8 sps:$4 sm:$0xff] (!%p1406_p0)   ;;  %v1643_v42 = vld [vmem:[#allocation6] ss:$8 sps:$4 sm:$0xff] (!%p1406_p0)  }
  0x7d   : > { %v431_v62 = vrot.slane %v430_v54, 1  ;;  %v411_v63 = vadd.f32 %v410_v57, %v409_v51  ;;  %v478_v7 = vrot.slane %v470_v60, %v2005_v59  ;;  %v469_v10 = vrot.slane %v462_v3, %v2005_v59  ;;  %v1641_v41 = vld [vmem:[#allocation6 + $0x4] ss:$8 sps:$4 sm:$0xff] (!%p1406_p0)   ;;  %v1616_v43 = vld [vmem:[#allocation6 + $0x160] ss:$8 sps:$4 sm:$0xff] (!%p1406_p0)  }
  0x7e   : > { %v418_v0 = vadd.f32 %v417_v58, %v416_v52  ;;  %v425_v1 = vadd.f32 %v424_v61, %v423_v53  ;;  %v461_v12 = vcombine.low %v453_v4, %v460_v5  ;;  %1200 = vmatpush1.bf16.msra.mxu0 (!%p1406_p0), %v1601_v31  ;;  %v1617_v44 = vld [vmem:[#allocation6 + $0x174] ss:$8 sps:$4 sm:$0xff] (!%p1406_p0)   ;;  %1156 = vmatprep.subr.bf16.mxu1 (!%p1406_p0), %v1641_v41  ;;  %v1649_v47 = vld [vmem:[#allocation6 + $0x10] ss:$8 sps:$4 sm:$0xff] (!%p1406_p0)   ;;  %v1653_v51 = vld [vmem:[#allocation6 + $0x24] ss:$8 sps:$4 sm:$0xff] (!%p1406_p0)  }
  0x7f   : > { %v432_v2 = vadd.f32 %v431_v62, %v430_v54  ;;  %1201 = vmatprep.subr.bf16.mxu0 (!%p1406_p0), %v1602_v32  ;;  %1157 = vmatpush1.bf16.msra.mxu1 (!%p1406_p0), %v1643_v42  ;;  %v1647_v45 = vld [vmem:[#allocation6 + $0x14] ss:$8 sps:$4 sm:$0xff] (!%p1406_p0)   ;;  %v1619_v50 = vld [vmem:[#allocation6 + $0x170] ss:$8 sps:$4 sm:$0xff] (!%p1406_p0)   ;;  %v1655_v53 = vld [vmem:[#allocation6 + $0x20] ss:$8 sps:$4 sm:$0xff] (!%p1406_p0)  }
  0x80   : > { %v471_v6 = vcombine.low %v411_v63, %v418_v0  ;;  %1158 = vmatprep.subr.bf16.mxu1 (!%p1406_p0), %v1647_v45  ;;  %v1620_v55 = vld [vmem:[#allocation6 + $0x184] ss:$8 sps:$4 sm:$0xff] (!%p1406_p0)   ;;  %v1659_v57 = vld [vmem:[#allocation6 + $0x34] ss:$8 sps:$4 sm:$0xff] (!%p1406_p0)   ;;  %v1622_v60 = vld [vmem:[#allocation6 + $0x180] ss:$8 sps:$4 sm:$0xff] (!%p1406_p0)  }
  0x81   : > { %v487_v8 = vcombine.low %v425_v1, %v432_v2  ;;  %v1623_v61 = vld [vmem:[#allocation6 + $0x194] ss:$8 sps:$4 sm:$0xff] (!%p1406_p0)   ;;  %v1661_v0 = vld [vmem:[#allocation6 + $0x30] ss:$8 sps:$4 sm:$0xff] (!%p1406_p0)   ;;  %v1665_v2 = vld [vmem:[#allocation6 + $0x44] ss:$8 sps:$4 sm:$0xff] (!%p1406_p0)  }
  0x82   : > { %v485_v9 = vrot.slane %v471_v6, %v2005_v59  ;;  %1202 = vmatpush1.bf16.msra.mxu0 (!%p1406_p0), %v1604_v33  ;;  %v1625_v3 = vld [vmem:[#allocation6 + $0x190] ss:$8 sps:$4 sm:$0xff] (!%p1406_p0)   ;;  %v1626_v4 = vld [vmem:[#allocation6 + $0x1a4] ss:$8 sps:$4 sm:$0xff] (!%p1406_p0)   ;;  %v1667_v5 = vld [vmem:[#allocation6 + $0x40] ss:$8 sps:$4 sm:$0xff] (!%p1406_p0)  }
  0x83   : > { %v494_v11 = vrot.slane %v487_v8, %v2005_v59  ;;  %1203 = vmatprep.subr.bf16.mxu0 (!%p1406_p0), %v1605_v34  ;;  %1159 = vmatpush1.bf16.msra.mxu1 (!%p1406_p0), %v1649_v47  ;;  %v1671_v6 = vld [vmem:[#allocation6 + $0x54] ss:$8 sps:$4 sm:$0xff] (!%p1406_p0)   ;;  %v1652_v28 = vld [vmem:[#allocation6 + $0x204] ss:$8 sps:$4 sm:$0xff] (!%p1406_p0)   ;;  %v1703_v29 = vld [vmem:[#allocation6 + $0xa0] ss:$8 sps:$4 sm:$0xff] (!%p1406_p0)  }
  0x84   : > { %v486_v13 = vcombine.low %v478_v7, %v485_v9  ;;  %1160 = vmatprep.subr.bf16.mxu1 (!%p1406_p0), %v1653_v51  ;;  %v1628_v7 = vld [vmem:[#allocation6 + $0x1a0] ss:$8 sps:$4 sm:$0xff] (!%p1406_p0)   ;;  %v1629_v8 = vld [vmem:[#allocation6 + $0x1b4] ss:$8 sps:$4 sm:$0xff] (!%p1406_p0)   ;;  %v1673_v9 = vld [vmem:[#allocation6 + $0x50] ss:$8 sps:$4 sm:$0xff] (!%p1406_p0)  }
  0x85   : > { %v510_v14 = vrot.slane %v494_v11, 7  ;;  %v1631_v11 = vld [vmem:[#allocation6 + $0x1b0] ss:$8 sps:$4 sm:$0xff] (!%p1406_p0)   ;;  %v1707_v30 = vld [vmem:[#allocation6 + $0xb4] ss:$8 sps:$4 sm:$0xff] (!%p1406_p0)   ;;  %vm1295_vm4 = vcmask (!%p1406_p0), 1041408  }
  0x86   : > { %v499_v15 = vrot.slane %v486_v13, 7  ;;  %1204 = vmatpush1.bf16.msra.mxu0 (!%p1406_p0), %v1607_v35  ;;  %v1679_v13 = vld [vmem:[#allocation6 + $0x60] ss:$8 sps:$4 sm:$0xff] (!%p1406_p0)   ;;  %v1658_v33 = vld [vmem:[#allocation6 + $0x214] ss:$8 sps:$4 sm:$0xff] (!%p1406_p0)   ;;  %vm1309_vm5 = vcmask (!%p1406_p0), 1024  }
  0x87   : > { %v511_v16 = vsel %vm500_vm0, %v510_v14, %v469_v10  ;;  %1205 = vmatprep.subr.bf16.mxu0 (!%p1406_p0), %v1608_v36  ;;  %1161 = vmatpush1.bf16.msra.mxu1 (!%p1406_p0), %v1655_v53  ;;  %v1677_v10 = vld [vmem:[#allocation6 + $0x64] ss:$8 sps:$4 sm:$0xff] (!%p1406_p0)   ;;  %v1650_v32 = vld [vmem:[#allocation6 + $0x200] ss:$8 sps:$4 sm:$0xff] (!%p1406_p0)   ;;  %v1709_v34 = vld [vmem:[#allocation6 + $0xb0] ss:$8 sps:$4 sm:$0xff] (!%p1406_p0)  }
  0x88   : > { %v501_v18 = vsel %vm500_vm0, %v499_v15, %v461_v12  ;;  %v512_v19 = vsel %vm502_vm1, %v510_v14, %v511_v16  ;;  %524 = sbr.rel (%p1406_p0) target bundleno = 616 (0x268), region = 56  ;;  %1162 = vmatprep.subr.bf16.mxu1 (!%p1406_p0), %v1659_v57  ;;  %v1632_v12 = vld [vmem:[#allocation6 + $0x1c4] ss:$8 sps:$4 sm:$0xff] (!%p1406_p0)   ;;  %v1635_v16 = vld [vmem:[#allocation6 + $0x1d4] ss:$8 sps:$4 sm:$0xff] (!%p1406_p0)  }
  0x89   : > { %v503_v21 = vsel %vm502_vm1, %v499_v15, %v501_v18  ;;  %v513_v22 = vsel %vm504_vm2, %v510_v14, %v512_v19  ;;  %v1689_v18 = vld [vmem:[#allocation6 + $0x84] ss:$8 sps:$4 sm:$0xff] (!%p1406_p0)   ;;  %v1637_v19 = vld [vmem:[#allocation6 + $0x1d0] ss:$8 sps:$4 sm:$0xff] (!%p1406_p0)   ;;  %v1715_v41 = vld [vmem:[#allocation6 + $0xc0] ss:$8 sps:$4 sm:$0xff] (!%p1406_p0)  }
  0x8a   : > { %v505_v23 = vsel %vm504_vm2, %v499_v15, %v503_v21  ;;  %v514_v24 = vsel %vm506_vm3, %v510_v14, %v513_v22  ;;  %1206 = vmatpush1.bf16.msra.mxu0 (!%p1406_p0), %v1610_v37  ;;  %v1683_v14 = vld [vmem:[#allocation6 + $0x74] ss:$8 sps:$4 sm:$0xff] (!%p1406_p0)   ;;  %v1691_v21 = vld [vmem:[#allocation6 + $0x80] ss:$8 sps:$4 sm:$0xff] (!%p1406_p0)   ;;  %v1713_v36 = vld [vmem:[#allocation6 + $0xc4] ss:$8 sps:$4 sm:$0xff] (!%p1406_p0)  }
  0x8b   : > { %v507_v25 = vsel %vm506_vm3, %v499_v15, %v505_v23  ;;  %v518_v26 = vadd.f32 %v514_v24, %v312_v17  ;;  %1207 = vmatprep.subr.bf16.mxu0 (!%p1406_p0), %v1611_v38  ;;  %1163 = vmatpush1.bf16.msra.mxu1 (!%p1406_p0), %v1661_v0  ;;  %v1634_v15 = vld [vmem:[#allocation6 + $0x1c0] ss:$8 sps:$4 sm:$0xff] (!%p1406_p0)   ;;  %v1685_v17 = vld [vmem:[#allocation6 + $0x70] ss:$8 sps:$4 sm:$0xff] (!%p1406_p0)   ;;  %v1695_v22 = vld [vmem:[#allocation6 + $0x94] ss:$8 sps:$4 sm:$0xff] (!%p1406_p0)  }
  0x8c   : > { %v517_v27 = vadd.f32 %v507_v25, %v311_v20  ;;  %1164 = vmatprep.subr.bf16.mxu1 (!%p1406_p0), %v1665_v2  ;;  %v1638_v20 = vld [vmem:[#allocation6 + $0x1e4] ss:$8 sps:$4 sm:$0xff] (!%p1406_p0)   ;;  %v1640_v23 = vld [vmem:[#allocation6 + $0x1e0] ss:$8 sps:$4 sm:$0xff] (!%p1406_p0)   ;;  %v1644_v24 = vld [vmem:[#allocation6 + $0x1f4] ss:$8 sps:$4 sm:$0xff] (!%p1406_p0)  }
  0x8d   : > { %520 = vst [vmem:[#allocation2 + $0x8] sm:$0xf] %v518_v26  ;;  %v1697_v25 = vld [vmem:[#allocation6 + $0x90] ss:$8 sps:$4 sm:$0xff] (!%p1406_p0)   ;;  %v1701_v26 = vld [vmem:[#allocation6 + $0xa4] ss:$8 sps:$4 sm:$0xff] (!%p1406_p0)  }
  0x8e   : > { %519 = vst [vmem:[#allocation2] sm:$0xff] %v517_v27  ;;  %1208 = vmatpush1.bf16.msra.mxu0 (!%p1406_p0), %v1613_v39  ;;  %v1646_v27 = vld [vmem:[#allocation6 + $0x1f0] ss:$8 sps:$4 sm:$0xff] (!%p1406_p0)   ;;  %v1719_v42 = vld [vmem:[#allocation6 + $0xd4] ss:$8 sps:$4 sm:$0xff] (!%p1406_p0)  }
  0x8f   : > { %1209 = vmatprep.subr.bf16.mxu0 %v1614_v40  ;;  %1165 = vmatpush1.bf16.msra.mxu1 %v1667_v5  ;;  %v1656_v38 = vld [vmem:[#allocation6 + $0x210] ss:$8 sps:$4 sm:$0xff]   ;;  %v1664_v40 = vld [vmem:[#allocation6 + $0x224] ss:$8 sps:$4 sm:$0xff]   ;;  %v1670_v47 = vld [vmem:[#allocation6 + $0x234] ss:$8 sps:$4 sm:$0xff]  }
  0x90   : > { %1166 = vmatprep.subr.bf16.mxu1 %v1671_v6  ;;  %v1727_v51 = vld [vmem:[#allocation6 + $0xe0] ss:$8 sps:$4 sm:$0xff]   ;;  %v1680_v57 = vld [vmem:[#allocation6 + $0x250] ss:$8 sps:$4 sm:$0xff]   ;;  %v1700_v0 = vld [vmem:[#allocation6 + $0x284] ss:$8 sps:$4 sm:$0xff]  }
  0x91   : > { %v1674_v53 = vld [vmem:[#allocation6 + $0x240] ss:$8 sps:$4 sm:$0xff]   ;;  %v1706_v2 = vld [vmem:[#allocation6 + $0x294] ss:$8 sps:$4 sm:$0xff]   ;;  %v1716_v6 = vld [vmem:[#allocation6 + $0x2b0] ss:$8 sps:$4 sm:$0xff]  }
  0x92   : > { %1210 = vmatpush1.bf16.msra.mxu0 %v1616_v43  ;;  %v1718_v5 = vld [vmem:[#allocation6 + $0x2b4] ss:$8 sps:$4 sm:$0xff]  }
  0x93   : > { %1211 = vmatprep.subr.bf16.mxu0 %v1617_v44  ;;  %1167 = vmatpush1.bf16.msra.mxu1 %v1673_v9  ;;  %v1662_v44 = vld [vmem:[#allocation6 + $0x220] ss:$8 sps:$4 sm:$0xff]   ;;  %v1730_v9 = vld [vmem:[#allocation6 + $0x2d4] ss:$8 sps:$4 sm:$0xff]  }
  0x94   : > { %1168 = vmatprep.subr.bf16.mxu1 %v1677_v10  ;;  %v526_v35 = vld [vmem:[#allocation2 + $0x8] sm:$0xf] }
  0x95   : > { %v525_v48 = vld [vmem:[#allocation2] sm:$0xff]  ;;  %v528_v37 = vmul.f32 0.03125, %v526_v35 }
  0x96   : > { %v527_v49 = vmul.f32 0.03125, %v525_v48  ;;  %1212 = vmatpush1.bf16.msra.mxu0 %v1619_v50  ;;  %v1721_v48 = vld [vmem:[#allocation6 + $0xd0] ss:$8 sps:$4 sm:$0xff]   ;;  %v1676_v50 = vld [vmem:[#allocation6 + $0x244] ss:$8 sps:$4 sm:$0xff]  }
  0x97   : > { %1213 = vmatprep.subr.bf16.mxu0 %v1620_v55  ;;  %1169 = vmatpush1.bf16.msra.mxu1 %v1679_v13  ;;  %v2027_v39 = vrot.slane %v528_v37, %v2005_v59  ;;  %v1682_v55 = vld [vmem:[#allocation6 + $0x254] ss:$8 sps:$4 sm:$0xff]   ;;  %v1728_v10 = vld [vmem:[#allocation6 + $0x2d0] ss:$8 sps:$4 sm:$0xff]  }
  0x98   : > { %v531_v52 = vcombine.high %v527_v49, %v527_v49  ;;  %v2015_v54 = vrot.slane %v527_v49, %v2005_v59  ;;  %1170 = vmatprep.subr.bf16.mxu1 %v1683_v14  ;;  %v1725_v49 = vld [vmem:[#allocation6 + $0xe4] ss:$8 sps:$4 sm:$0xff]   ;;  %v1739_v13 = vld [vmem:[#allocation6 + $0x2f4] ss:$8 sps:$4 sm:$0xff]   ;;  %v1737_v14 = vld [vmem:[#allocation6 + $0x2f0] ss:$8 sps:$4 sm:$0xff]  }
  0x99   : > { %v555_v43 = vcombine.high %v2027_v39, %v2027_v39 }
  0x9a   : > { %v2018_v56 = vrot.slane %v531_v52, %v2005_v59  ;;  %v546_v58 = vcombine.high %v2015_v54, %v2015_v54  ;;  %1214 = vmatpush1.bf16.msra.mxu0 %v1622_v60  ;;  %v1668_v59 = vld [vmem:[#allocation6 + $0x230] ss:$8 sps:$4 sm:$0xff]   ;;  %v1731_v52 = vld [vmem:[#allocation6 + $0xf4] ss:$8 sps:$4 sm:$0xff]   ;;  %v1688_v60 = vld [vmem:[#allocation6 + $0x264] ss:$8 sps:$4 sm:$0xff]  }
  0x9b   : > { %1215 = vmatprep.subr.bf16.mxu0 %v1623_v61  ;;  %1171 = vmatpush1.bf16.msra.mxu1 %v1685_v17  ;;  %v567_v45 = vpack.c.bf16 %v555_v43, %v555_v43  ;;  %v1686_v61 = vld [vmem:[#allocation6 + $0x260] ss:$8 sps:$4 sm:$0xff]  }
  0x9c   : > { %v547_v62 = vcombine.high %v2018_v56, %v2018_v56  ;;  %v563_v63 = vpack.c.bf16 %v546_v58, %v546_v58  ;;  %1172 = vmatprep.subr.bf16.mxu1 %v1689_v18  ;;  %v564_v31 = vpack.c.bf16 %v2018_v56, %v2018_v56  ;;  %v1733_v56 = vld [vmem:[#allocation6 + $0xf0] ss:$8 sps:$4 sm:$0xff]   ;;  %v562_v58 = vpack.c.bf16 %v2015_v54, %v2015_v54  ;;  %v1712_v54 = vld [vmem:[#allocation6 + $0x2a4] ss:$8 sps:$4 sm:$0xff]  }
  0x9e   : > { %v565_v1 = vpack.c.bf16 %v547_v62, %v547_v62  ;;  %1188 = vmatprep.mubr.bf16.mxu1 %v563_v63  ;;  %1216 = vmatpush1.bf16.msra.mxu0 %v1625_v3  ;;  %v1694_v62 = vld [vmem:[#allocation6 + $0x274] ss:$8 sps:$4 sm:$0xff]   ;;  %v1692_v63 = vld [vmem:[#allocation6 + $0x270] ss:$8 sps:$4 sm:$0xff]  }
  0x9f   : > { %1217 = vmatprep.subr.bf16.mxu0 %v1626_v4  ;;  %1173 = vmatpush1.bf16.msra.mxu1 %v1691_v21  ;;  %v1704_v3 = vld [vmem:[#allocation6 + $0x290] ss:$8 sps:$4 sm:$0xff]   ;;  %v1710_v4 = vld [vmem:[#allocation6 + $0x2a0] ss:$8 sps:$4 sm:$0xff]  }
  0xa0   : > { %1229 = vmatprep.mubr.bf16.mxu0 %v565_v1  ;;  %1174 = vmatprep.subr.bf16.mxu1 %v1695_v22  ;;  %v1698_v1 = vld [vmem:[#allocation6 + $0x280] ss:$8 sps:$4 sm:$0xff]   ;;  %v664_v21 = vld [vmem:[%s2066_s2] sm:$0x3]  ;;  %v672_v22 = vsub.s32 1, %v2002_v46 }
  0xa2   : > { %1218 = vmatpush1.bf16.msra.mxu0 %v1628_v7  ;;  %v1724_v7 = vld [vmem:[#allocation6 + $0x2c4] ss:$8 sps:$4 sm:$0xff]  }
  0xa3   : > { %1219 = vmatprep.subr.bf16.mxu0 %v1629_v8  ;;  %1175 = vmatpush1.bf16.msra.mxu1 %v1697_v25  ;;  %v1722_v8 = vld [vmem:[#allocation6 + $0x2c0] ss:$8 sps:$4 sm:$0xff]  }
  0xa4   : > { %1176 = vmatprep.subr.bf16.mxu1 %v1701_v26 }
  0xa6   : > { %1220 = vmatpush1.bf16.msra.mxu0 %v1631_v11  ;;  %v1736_v11 = vld [vmem:[#allocation6 + $0x2e4] ss:$8 sps:$4 sm:$0xff]  }
  0xa7   : > { %1221 = vmatprep.subr.bf16.mxu0 %v1632_v12  ;;  %1177 = vmatpush1.bf16.msra.mxu1 %v1703_v29  ;;  %v1734_v12 = vld [vmem:[#allocation6 + $0x2e0] ss:$8 sps:$4 sm:$0xff]  }
  0xa8   : > { %1178 = vmatprep.subr.bf16.mxu1 %v1707_v30 }
  0xaa   : > { %1222 = vmatpush1.bf16.msra.mxu0 %v1634_v15  ;;  %v566_v15 = vpack.c.bf16 %v2027_v39, %v2027_v39 }
  0xab   : > { %1223 = vmatprep.subr.bf16.mxu0 %v1635_v16  ;;  %1179 = vmatpush1.bf16.msra.mxu1 %v1709_v34 }
  0xac   : > { %1180 = vmatprep.subr.bf16.mxu1 %v1713_v36 }
  0xae   : > { %1224 = vmatpush1.bf16.msra.mxu0 %v1637_v19 }
  0xaf   : > { %1225 = vmatprep.subr.bf16.mxu0 %v1638_v20  ;;  %1181 = vmatpush1.bf16.msra.mxu1 %v1715_v41  ;;  %v668_v20 = vsub.s32 0, %v2002_v46 }
  0xb0   : > { %1182 = vmatprep.subr.bf16.mxu1 %v1719_v42  ;;  %v1503_v42 = vld [vmem:[#allocation3] ss:$0 sm:$0xff] }
  0xb2   : > { %1226 = vmatpush1.bf16.msra.mxu0 %v1640_v23  ;;  %v669_v23 = vrot.slane %v664_v21, %v668_v20 }
  0xb3   : > { %1227 = vmatprep.subr.bf16.mxu0 %v1644_v24  ;;  %1183 = vmatpush1.bf16.msra.mxu1 %v1721_v48  ;;  %v673_v24 = vrot.slane %v664_v21, %v672_v22 }
  0xb4   : > { %1184 = vmatprep.subr.bf16.mxu1 %v1725_v49 }
  0xb6   : > { %1228 = vmatpush1.bf16.msra.mxu0 %v1646_v27  ;;  %v1281_v27 = vld [vmem:[%s2067_s3] sm:$0x3] }
  0xb7   : > { %1238 = vmatprep.subr.bf16.mxu0 %v1652_v28  ;;  %1185 = vmatpush1.bf16.msra.mxu1 %v1727_v51  ;;  %v1290_v34 = vrot.slane %v1281_v27, %v672_v22 }
  0xb8   : > { %1186 = vmatprep.subr.bf16.mxu1 %v1731_v52 }
  0xb9   : > { %1230 = vmatmul.mubr.bf16.vlgmr.msra.gmra.mrb[0].mxu0 %v564_v31  ;;  %v1286_v31 = vrot.slane %v1281_v27, %v668_v20 }
  0xba   : > { %1239 = vmatpush1.bf16.msra.mxu0 %v1650_v32  ;;  %1270 = vmatprep.mubr.bf16.mxu0 %v567_v45 }
  0xbb   : > { %1240 = vmatprep.subr.bf16.mxu0 %v1658_v33  ;;  %1187 = vmatpush1.bf16.msra.mxu1 %v1733_v56 }
  0xbe   : > { %1241 = vmatpush1.bf16.msra.mxu0 %v1656_v38  ;;  %1189 = vmatmul.mubr.bf16.vlgmr.msra.gmra.mrb[0].mxu1 %v562_v58 }
  0xbf   : > { %1242 = vmatprep.subr.bf16.mxu0 %v1664_v40 }
  0xc2   : > { %1243 = vmatpush1.bf16.msra.mxu0 %v1662_v44 }
  0xc3   : > { %1244 = vmatprep.subr.bf16.mxu0 %v1670_v47 }
  0xc6   : > { %1245 = vmatpush1.bf16.msra.mxu0 %v1668_v59 }
  0xc7   : > { %1246 = vmatprep.subr.bf16.mxu0 %v1676_v50 }
  0xca   : > { %1247 = vmatpush1.bf16.msra.mxu0 %v1674_v53 }
  0xcb   : > { %1248 = vmatprep.subr.bf16.mxu0 %v1682_v55 }
  0xce   : > { %1249 = vmatpush1.bf16.msra.mxu0 %v1680_v57 }
  0xcf   : > { %1250 = vmatprep.subr.bf16.mxu0 %v1688_v60 }
  0xd2   : > { %1251 = vmatpush1.bf16.msra.mxu0 %v1686_v61 }
  0xd3   : > { %1252 = vmatprep.subr.bf16.mxu0 %v1694_v62 }
  0xd6   : > { %1253 = vmatpush1.bf16.msra.mxu0 %v1692_v63 }
  0xd7   : > { %1254 = vmatprep.subr.bf16.mxu0 %v1700_v0 }
  0xda   : > { %1255 = vmatpush1.bf16.msra.mxu0 %v1698_v1 }
  0xdb   : > { %1256 = vmatprep.subr.bf16.mxu0 %v1706_v2 }
  0xde   : > { %1257 = vmatpush1.bf16.msra.mxu0 %v1704_v3 }
  0xdf   : > { %1258 = vmatprep.subr.bf16.mxu0 %v1712_v54 }
  0xe2   : > { %1259 = vmatpush1.bf16.msra.mxu0 %v1710_v4 }
  0xe3   : > { %1260 = vmatprep.subr.bf16.mxu0 %v1718_v5 }
  0xe6   : > { %1261 = vmatpush1.bf16.msra.mxu0 %v1716_v6 }
  0xe7   : > { %1262 = vmatprep.subr.bf16.mxu0 %v1724_v7 }
  0xea   : > { %1263 = vmatpush1.bf16.msra.mxu0 %v1722_v8 }
  0xeb   : > { %1264 = vmatprep.subr.bf16.mxu0 %v1730_v9 }
  0xee   : > { %1265 = vmatpush1.bf16.msra.mxu0 %v1728_v10 }
  0xef   : > { %1266 = vmatprep.subr.bf16.mxu0 %v1736_v11 }
  0xf2   : > { %1267 = vmatpush1.bf16.msra.mxu0 %v1734_v12 }
  0xf3   : > { %1268 = vmatprep.subr.bf16.mxu0 %v1739_v13 }
  0xf6   : > { %1269 = vmatpush1.bf16.msra.mxu0 %v1737_v14 }
  0xf9   : > { %1271 = vmatmul.mubr.bf16.vlgmr.msra.gmra.mrb[0].mxu0 %v566_v15 }
 0x191   : > { %v1190_v16 = vpop.f32.mrb[0].mxu1 }
 0x192   : > { %v1192_v17 = vpop.f32.mrb[1].mxu1  ;;  %v1191_v25 = vadd.f32 %v1190_v16, %v669_v23 }
 0x193   : > { %v1194_v18 = vpop.f32.mrb[2].mxu1  ;;  %v1193_v26 = vadd.f32 %v1192_v17, %v673_v24 }
 0x194   : > { %v1195_v19 = vpop.f32.mrb[3].mxu1 }
 0x1cc   : > { %v1272_v28 = vpop.f32.mrb[0].mxu0 }
 0x1cd   : > { %v1508_v29 = vadd.f32 %v1272_v28, %v1191_v25  ;;  %v1274_v30 = vpop.f32.mrb[1].mxu0 }
 0x1ce   : > { %v1510_v32 = vadd.f32 %v1274_v30, %v1193_v26  ;;  %v1276_v33 = vpop.f32.mrb[2].mxu0 }
 0x1cf   : > { %v1279_v35 = vmax.f32 %v1508_v29, 0.0  ;;  %v1277_v36 = vpop.f32.mrb[3].mxu0 }
 0x1d0   : > { %v1280_v37 = vmax.f32 %v1510_v32, 0.0 }
 0x1d1   : > { %v1293_v46 = vmul.f32 %v1286_v31, %v1279_v35 }
 0x1d2   : > { %v1294_v38 = vmul.f32 %v1290_v34, %v1280_v37 }
 0x1d3   : > { %v1296_v39 = vsel %vm1295_vm4, %v1293_v46, 0.0 }
 0x1d4   : > { %v1297_v40 = vsel %vm1295_vm4, %v1294_v38, 0.0 }
 0x1d5   : > { %v1298_v41 = vadd.f32 %v1297_v40, %v1296_v39 }
 0x1d7   : > { %1299 = vadd.xlane.f32.xlu0 %v1298_v41 }
 0x264   : > { %v1300_v43 = vpop.xlane.xlu0 %1299 }
 0x265   : > { %v1308_v44 = vadd.f32 %v1503_v42, %v1300_v43 }
 0x267   : > { %1310 = vst.msk [vmem:[%s2069_s5] sm:$0x3] %vm1309_vm5, %v1308_v44 }
 0x268 PF: > { %s21_s25 = sadd.s32 1, %s1822_s25   ;;  %s2084_s20 = smov %s1806_s21 }
 0x269   : > { %p18_p1 = scmp.ge.s32.totalorder %s21_s25, 4   ;;  %s2085_s21 = smov %s1810_s22 }
 0x26a   : > { %s2086_s22 = smov %s1924_s7  ;;  %s2087_s23 = smov %s1818_s24 }
 0x26b   : > { %s2088_s24 = smov %s2090_s26  ;;  %20 = sbr.rel (!%p18_p1) target bundleno = 8 (0x8), region = 97 }
 0x272   :  { %1330 = vsyncpa [#allocation5], 1 }
 0x273   :  { %1332 = vsyncpa [#allocation5 + $0x1], 1 }
 0x274   :  { %1333 = vsyncpa [#allocation7], 1 }

</bundles_post_ra>
